<compile_context>
chip_gen: v7x
topology: tpu7x:2x2x1
jax: 0.10.0
libtpu: 0.0.40
codegen_flags: <defaults>
</compile_context>

<pallas_src>
from functools import partial

import jax
import jax.numpy as jnp
from jax import lax
from jax.experimental import pallas as pl
from jax.experimental.pallas import tpu as pltpu

_LANE = 128
_SUBLANE = 8


# ----------------------------------------------------------------------------
# Counter-based PRNG: lowbias32 mixer (good avalanche on counter inputs).
# ----------------------------------------------------------------------------
def _mix32(h):
    """lowbias32 on jnp uint32 arrays (usable in-kernel and in the reference)."""
    h = h ^ (h >> 16)
    h = h * jnp.uint32(0x7FEB352D)
    h = h ^ (h >> 15)
    h = h * jnp.uint32(0x846CA68B)
    h = h ^ (h >> 16)
    return h


def _mix32_py(v):
    """Same mixer on a Python int (host-side seed pre-mix)."""
    v &= 0xFFFFFFFF
    v ^= v >> 16
    v = (v * 0x7FEB352D) & 0xFFFFFFFF
    v ^= v >> 15
    v = (v * 0x846CA68B) & 0xFFFFFFFF
    v ^= v >> 16
    return v


def _premix_seed(seed):
    return _mix32_py((int(seed) ^ 0x9E3779B9) & 0xFFFFFFFF)


def _threshold_and_scale(p):
    # keep iff uint32 hash < threshold, threshold = round((1-p) * 2^32).
    # Clamped to [1, 2^32-1]: keep-probability is off by at most 2^-32.
    threshold = int(round((1.0 - p) * float(1 << 32)))
    threshold = max(1, min(threshold, (1 << 32) - 1))
    return threshold, 1.0 / (1.0 - p)


# ----------------------------------------------------------------------------
# Kernel
# ----------------------------------------------------------------------------
def _dropout_kernel(seed_ref, x_ref, o_ref, *, block_rows, threshold, scale):
    """Inverted dropout on one (block_rows, 128) VMEM tile.

    seed_ref: SMEM scalar-prefetch ref, int32[1] holding the pre-mixed seed.
    keep(i)  = lowbias32(global_flat_index(i) ^ seed) < threshold.
    """
    shape = x_ref.shape                                      # static (block_rows, 128)
    row0 = pl.program_id(0).astype(jnp.uint32) * jnp.uint32(block_rows)
    r_iota = lax.broadcasted_iota(jnp.uint32, shape, 0)
    c_iota = lax.broadcasted_iota(jnp.uint32, shape, 1)
    gidx = (row0 + r_iota) * jnp.uint32(_LANE) + c_iota      # global flat element idx
    bits = _mix32(gidx ^ seed_ref[0].astype(jnp.uint32))
    keep = bits < jnp.uint32(threshold)

    x = x_ref[...]
    # Native-dtype math: exact for f32, single bf16 multiply on v6e/v7x VALU.
    o_ref[...] = jnp.where(keep, x * jnp.asarray(scale, x.dtype),
                           jnp.zeros((), x.dtype))


# ----------------------------------------------------------------------------
# Block sizing (generation aware)
# ----------------------------------------------------------------------------
def _vmem_capacity_bytes():
    try:
        return int(pltpu.get_tpu_info().vmem_capacity_bytes)
    except Exception:
        return 64 * 1024 * 1024          # conservative (v7x-sized) default


def _choose_block_rows(rows, itemsize):
    """Big enough to amortize ~0.35us/step overhead, small enough that double
    buffers + elementwise temporaries fit the generation's VMEM, and never so
    big that the grid collapses below ~4 blocks (keeps both v7x TCs busy)."""
    pack = max(1, 4 // itemsize)         # 1 f32, 2 bf16/f16, 4 int8/fp8
    sub = _SUBLANE * pack                # dtype-aware sublane granularity
    if rows <= sub:
        return rows                      # single block == full array (always legal)
    vmem = _vmem_capacity_bytes()
    target_bytes = (8 << 20) if vmem > (64 << 20) else (4 << 20)
    br = max(sub, target_bytes // (_LANE * itemsize) // sub * sub)
    # Keep >= ~4 blocks when possible so the "parallel" axis feeds 2 TCs (v7x).
    quarter = max(sub, pl.cdiv(pl.cdiv(rows, 4), sub) * sub)
    br = min(br, quarter, rows // sub * sub)
    return max(br, sub)


# ----------------------------------------------------------------------------
# Wrapper
# ----------------------------------------------------------------------------
def dropout(x, *, p=0.0, seed=0):
    """nn.Dropout(p) forward (training semantics; p == 0.0 is the identity)."""
    p = float(p)
    if p <= 0.0:
        return x                         # module default: identity, no kernel
    if p >= 1.0:
        return jnp.zeros_like(x)
    if x.size == 0:
        return x

    orig_shape = x.shape
    flat = x.reshape(-1)                 # free for contiguous/default layouts
    n = flat.shape[0]

    # Lane alignment: numel % 128 == 0 needs NO pad (boundary blocks of the
    # cdiv grid are masked).  Otherwise pad fewer than 128 elements.
    rem = n % _LANE
    if rem:
        # TODO(synk): a rank-1 / manual-DMA tail would make this path copy-free too.
        flat = jnp.pad(flat, (0, _LANE - rem))
    rows = flat.shape[0] // _LANE
    x2d = flat.reshape(rows, _LANE)

    itemsize = jnp.dtype(x.dtype).itemsize
    block_rows = _choose_block_rows(rows, itemsize)
    grid = (pl.cdiv(rows, block_rows),)
    block_bytes = block_rows * _LANE * itemsize

    threshold, scale = _threshold_and_scale(p)
    seed_mixed = _premix_seed(seed)
    # SMEM scalar is int32; the kernel reinterprets it back to uint32.
    seed_i32 = seed_mixed - (1 << 32) if seed_mixed >= (1 << 31) else seed_mixed
    seed_arr = jnp.asarray([seed_i32], jnp.int32)

    kern = partial(_dropout_kernel, block_rows=block_rows,
                   threshold=threshold, scale=scale)

    # 2x in + 2x out buffers (4x block) plus ~4-5 block-sized u32 temporaries
    # from the elementwise hash chain; keep headroom under physical VMEM.
    vmem_cap = _vmem_capacity_bytes()
    vmem_limit = min(max(32 << 20, 9 * block_bytes + (8 << 20)),
                     vmem_cap - (12 << 20))
    vmem_limit = max(vmem_limit, 16 << 20)

    cost = None
    if hasattr(pl, "CostEstimate"):
        cost = pl.CostEstimate(flops=12 * rows * _LANE, transcendentals=0,
                               bytes_accessed=2 * rows * _LANE * itemsize)

    out2d = pl.pallas_call(
        kern,
        out_shape=jax.ShapeDtypeStruct((rows, _LANE), x.dtype),
        grid_spec=pltpu.PrefetchScalarGridSpec(
            num_scalar_prefetch=1,
            grid=grid,
            in_specs=[pl.BlockSpec((block_rows, _LANE),
                                   lambda i, seed_ref: (i, 0))],
            out_specs=pl.BlockSpec((block_rows, _LANE),
                                   lambda i, seed_ref: (i, 0)),
        ),
        compiler_params=pltpu.CompilerParams(
            dimension_semantics=("parallel",),   # independent tiles; v7x 2-TC shard
            vmem_limit_bytes=int(vmem_limit),
        ),
        cost_estimate=cost,
    )(seed_arr, x2d)

    out = out2d.reshape(-1)
    if rem:
        out = out[:n]
    return out.reshape(orig_shape)


# ----------------------------------------------------------------------------
# Pure-jnp golden model (identical mask semantics) for testing.
# ----------------------------------------------------------------------------
def _dropout_reference(x, p, seed):
    threshold, scale = _threshold_and_scale(float(p))
    gidx = jnp.arange(x.size, dtype=jnp.uint32)
    bits = _mix32(gidx ^ jnp.uint32(_premix_seed(seed)))
    keep = (bits < jnp.uint32(threshold)).reshape(x.shape)
    return jnp.where(keep, x * jnp.asarray(scale, x.dtype),
                     jnp.zeros((), x.dtype)).astype(x.dtype)


if __name__ == "__main__":
    key = jax.random.PRNGKey(0)
    x = jax.random.normal(key, (2, 4, 16, 16), dtype=jnp.float32)  # NCHW feature map

    # Module default p = 0.0 -> identity (handled without a kernel launch).
    y0 = dropout(x, p=0.0, seed=0)
    jax.block_until_ready(y0)
    assert y0.shape == x.shape and y0.dtype == x.dtype
    assert bool(jnp.allclose(y0, x)), "p=0.0 dropout must be the identity"

    # p = 0.5: main kernel path; compare against the pure-jnp golden model.
    p = 0.5
    y = dropout(x, p=p, seed=1234)
    jax.block_until_ready(y)
    assert y.shape == x.shape and y.dtype == x.dtype
    y_ref = _dropout_reference(x, p, 1234)
    assert bool(jnp.allclose(y, y_ref, rtol=1e-6, atol=1e-6)), \
        "kernel mask/scaling disagrees with reference"
    kept = y != 0.0
    assert bool(jnp.allclose(jnp.where(kept, y, 0.0),
                             jnp.where(kept, x / (1.0 - p), 0.0),
                             rtol=1e-6, atol=1e-6)), \
        "kept elements must be scaled by 1/(1-p)"
    keep_frac = float(jnp.mean(kept.astype(jnp.float32)))
    assert 0.25 < keep_frac < 0.75, f"keep fraction {keep_frac} far from 1-p"

    # Determinism: same (input, seed) -> identical output.
    y_again = dropout(x, p=p, seed=1234)
    assert bool(jnp.array_equal(y, y_again)), "same seed must give same mask"

    # rows % block_rows != 0 exercises the masked boundary block (no padding).
    x_b = jax.random.normal(jax.random.PRNGKey(1), (2, 3, 16, 16), jnp.float32)
    y_b = dropout(x_b, p=0.3, seed=7)
    jax.block_until_ready(y_b)
    assert bool(jnp.allclose(y_b, _dropout_reference(x_b, 0.3, 7),
                             rtol=1e-6, atol=1e-6))

    # numel % 128 != 0 exercises the small padded-tail fallback.
    x_odd = jax.random.normal(jax.random.PRNGKey(2), (3, 5, 7), jnp.float32)
    y_odd = dropout(x_odd, p=0.25, seed=42)
    jax.block_until_ready(y_odd)
    assert y_odd.shape == x_odd.shape
    assert bool(jnp.allclose(y_odd, _dropout_reference(x_odd, 0.25, 42),
                             rtol=1e-6, atol=1e-6))

    print("KERNEL_OK")
</pallas_src>

<mosaic_0001>
module attributes {stable_mosaic.version = 11 : i64} {
  func.func @_dropout_kernel(%arg0: i32, %arg1: memref<1xi32, #tpu.memory_space<smem>>, %arg2: memref<8x128xf32, #tpu.memory_space<vmem>>, %arg3: memref<8x128xf32, #tpu.memory_space<vmem>>) attributes {dimension_semantics = [#tpu.dimension_semantics<parallel>], iteration_bounds = array<i64: 2>, scalar_prefetch = 1 : i64, scratch_operands = 0 : i64, tpu.core_type = #tpu.core_type<tc>, window_params = [{transform_indices = @transform_0, window_bounds = array<i64: 8, 128>}, {transform_indices = @transform_1, window_bounds = array<i64: 8, 128>}]} {
    %c8_i32 = arith.constant 8 : i32
    %0 = arith.muli %arg0, %c8_i32 : i32
    %1 = tpu.iota {dimensions = array<i32: 0>} : vector<8x128xi32>
    %2 = tpu.iota {dimensions = array<i32: 1>} : vector<8x128xi32>
    %3 = vector.broadcast %0 : i32 to vector<8x128xi32>
    %4 = arith.addi %3, %1 : vector<8x128xi32>
    %c128_i32 = arith.constant 128 : i32
    %5 = vector.broadcast %c128_i32 : i32 to vector<8x128xi32>
    %6 = arith.muli %4, %5 : vector<8x128xi32>
    %7 = arith.addi %6, %2 : vector<8x128xi32>
    %c0 = arith.constant 0 : index
    %8 = memref.load %arg1[%c0] : memref<1xi32, #tpu.memory_space<smem>>
    %9 = vector.broadcast %8 : i32 to vector<8x128xi32>
    %10 = arith.xori %7, %9 : vector<8x128xi32>
    %c16_i32 = arith.constant 16 : i32
    %11 = vector.broadcast %c16_i32 : i32 to vector<8x128xi32>
    %12 = arith.shrui %10, %11 : vector<8x128xi32>
    %13 = arith.xori %10, %12 : vector<8x128xi32>
    %c2146121005_i32 = arith.constant 2146121005 : i32
    %14 = vector.broadcast %c2146121005_i32 : i32 to vector<8x128xi32>
    %15 = arith.muli %13, %14 : vector<8x128xi32>
    %c15_i32 = arith.constant 15 : i32
    %16 = vector.broadcast %c15_i32 : i32 to vector<8x128xi32>
    %17 = arith.shrui %15, %16 : vector<8x128xi32>
    %18 = arith.xori %15, %17 : vector<8x128xi32>
    %c-2073254261_i32 = arith.constant -2073254261 : i32
    %19 = vector.broadcast %c-2073254261_i32 : i32 to vector<8x128xi32>
    %20 = arith.muli %18, %19 : vector<8x128xi32>
    %c16_i32_0 = arith.constant 16 : i32
    %21 = vector.broadcast %c16_i32_0 : i32 to vector<8x128xi32>
    %22 = arith.shrui %20, %21 : vector<8x128xi32>
    %23 = arith.xori %20, %22 : vector<8x128xi32>
    %c-2147483648_i32 = arith.constant -2147483648 : i32
    %24 = vector.broadcast %c-2147483648_i32 : i32 to vector<8x128xi32>
    %25 = arith.cmpi ult, %23, %24 : vector<8x128xi32>
    %c0_1 = arith.constant 0 : index
    %c0_2 = arith.constant 0 : index
    %26 = vector.load %arg2[%c0_1, %c0_2] : memref<8x128xf32, #tpu.memory_space<vmem>>, vector<8x128xf32>
    %cst = arith.constant 2.000000e+00 : f32
    %27 = vector.broadcast %cst : f32 to vector<8x128xf32>
    %28 = arith.mulf %26, %27 : vector<8x128xf32>
    %cst_3 = arith.constant 0.000000e+00 : f32
    %29 = vector.broadcast %cst_3 : f32 to vector<8x128xf32>
    %30 = arith.select %25, %28, %29 : vector<8x128xi1>, vector<8x128xf32>
    %c0_4 = arith.constant 0 : index
    %c0_5 = arith.constant 0 : index
    %31 = vector.load %arg3[%c0_4, %c0_5] : memref<8x128xf32, #tpu.memory_space<vmem>>, vector<8x128xf32>
    tpu.vector_store %arg3[%c0_4, %c0_5], %30 {strides = array<i32>} : memref<8x128xf32, #tpu.memory_space<vmem>>, vector<8x128xf32>,
    return
  }
  func.func @transform_0(%arg0: i32, %arg1: memref<1xi32, #tpu.memory_space<smem>>) -> (i32, i32) {
    %c0_i32 = arith.constant 0 : i32
    %c0_i32_0 = arith.constant 0 : i32
    return %arg0, %c0_i32 : i32, i32
  }
  func.func @transform_1(%arg0: i32, %arg1: memref<1xi32, #tpu.memory_space<smem>>) -> (i32, i32) {
    %c0_i32 = arith.constant 0 : i32
    %c0_i32_0 = arith.constant 0 : i32
    return %arg0, %c0_i32 : i32, i32
  }
}

</mosaic_0001>

<bundles_post_ra>
// kernel: tpu_custom_call.1
= control target key start
LH: loop header
LB: loop body
LE: loop exit
PB: predicated region body
PF: predicated region fallthrough
CT: control target
= control target key end

     0   :  { %s582_s0 = inlined_call_operand.<no memory space> [shape: s32[1], index: 0, kind: input, shape index: {}]   ;;  %s583_s1 = inlined_call_operand.hbm [shape: f32[16,128], index: 1, kind: input, shape index: {}]   ;;  %s584_s2 = inlined_call_operand.hbm [shape: f32[16,128], index: 2, kind: output, shape index: {}]  }
   0x1   :  { %7 = sst [smem:[#allocation3]] %s582_s0 }
   0x2   :  { %8 = vsyncpa [#allocation5], 0 }
   0x3   :  { %10 = vsyncpa [#allocation5 + $0x1], 0 }
   0x4   :  { %11 = vsyncpa [#allocation6], 0 }
   0x5   :  { %13 = vsyncpa [#allocation6 + $0x1], 0  ;;  %s420_s11 = smov 0   ;;  %s422_s12 = smov 0  }
   0x6   :  { %s424_s13 = smov 0   ;;  %s426_s14 = smov 0  }
   0x7 LB: > { %s441_s0 = sadd.s32 4294967295, %s398_s14   ;;  %s243_s15 = sadd.s32 4294967294, %s398_s14   ;;  %s398_s14 = sphi %s426_s14, %s599_s14   ;;  %s394_s13 = sphi %s424_s13, %s598_s13   ;;  %s390_s12 = sphi %s422_s12, %s597_s12   ;;  %s386_s11 = sphi %s420_s11, %s596_s11  }
   0x8   : > { %s445_s16 = sadd.s32 1, %s398_s14   ;;  %s26_s17 = sadd.s32 1, %s394_s13 }
   0x9   : > { %s23_s18 = ssub.s32 %s398_s14, %s445_s16  ;;  %p33_p0 = scmp.ne.s32.totalorder %s394_s13, %s390_s12 }
   0xa   : > { %p24_p1 = scmp.eq.s32.totalorder %s23_s18, 0  ;;  %p34_p2 = scmp.eq.s32.totalorder %s398_s14, 0 }
   0xb   : > { %p39_p3 = scmp.ne.s32.totalorder %s390_s12, %s386_s11  ;;  %p40_p4 = scmp.eq.s32.totalorder %s441_s0, 0 }
   0xc   : > { %s457_s19 = scalar_select %p24_p1, %s394_s13, %s26_s17  }
   0xd   : > { %p459_p5 = por %p34_p2, %p33_p0  ;;  %p463_p6 = por %p40_p4, %p39_p3 }
   0xe   : > { %p63_p7 = scmp.eq.s32.totalorder %s441_s0, 1  ;;  %p69_p8 = scmp.eq.s32.totalorder %s243_s15, 1 }
   0xf   : > { %p268_p10 = scmp.lt.s32.totalorder %s398_s14, 2  ;;  %s89_s24 = sand.u32 1, %s394_s13  }
  0x10   : > { %p470_p11 = por %p63_p7, %p33_p0  ;;  %p474_p12 = por %p69_p8, %p39_p3 }
  0x11   : > { %s247_s25 = sshll.u32 %s398_s14, 7  ;;  %s246_s26 = sshll.u32 %s89_s24, 3 }
  0x12   : > { %s588_s22 = scalar_select %p470_p11, 1, 0 }
  0x13   : > { %s589_s23 = scalar_select %p474_p12, 1, 0 }
  0x14   : > { %s483_s29 = scalar_lea.hbm %s583_s1, %s247_s25  ;;  %s93_s30 = scalar_lea.vmem [#allocation4], %s246_s26 }
  0x15   : > { %s100_s3 = sshll.u32 %s93_s30, 4  ;;  %p487_p13 = pnand %p268_p10, %p459_p5  ;;  %s491_s3 = int_to_ptr.vmem [resolvable:$true] %s100_s3 }
  0x16   : > { %s90_s5 = scalar_lea.sflag [#allocation5], %s89_s24  ;;  %s302_s6 = scalar_lea.hbm %s483_s29, 128 }
  0x17   : > { %p303_p2 = scmp.ne.s32.totalorder %s483_s29, %s302_s6  ;;  %p304_p3 = pneg %p487_p13 }
  0x18   : > { %s307_s9 = scalar_lea.hbm %s583_s1, 256  ;;  %p308_p5 = scmp.lt.u32.totalorder %s483_s29, %s583_s1 }
  0x19   : > { %p305_p4 = pnand %p304_p3, %p303_p2  ;;  %p309_p8 = scmp.lt.u32.totalorder %s307_s9, %s302_s6 }
  0x1a   : > { %p311_p9 = scmp.lt.u32.totalorder %s302_s6, %s483_s29 }
  0x1b   : > { %p306_p7 = pneg %p305_p4  ;;  %p310_p10 = por %p309_p8, %p308_p5 }
  0x1d   : > { %p312_p0 = por %p311_p9, %p310_p10 }
  0x1f   : > { %p313_p1 = pnand %p312_p0, %p306_p7 }
  0x21   : > { %316 = shalt.err (!%p313_p1)
}
  0x22   : > { %s317_s17 = scalar_lea.vmem %s491_s3, 128  ;;  %s400_s18 = smov [#allocation4]  }
  0x23   : > { %p318_p2 = scmp.ne.s32.totalorder %s491_s3, %s317_s17  ;;  %s322_s20 = sshll.u32 %s400_s18, 4  ;;  %s323_s20 = int_to_ptr.vmem [resolvable:$false] %s322_s20 }
  0x24   : > { %s324_s24 = scalar_lea.vmem %s323_s20, 256  ;;  %p325_p11 = scmp.lt.s32.totalorder %s491_s3, %s323_s20 }
  0x25   : > { %p320_p4 = pnand %p318_p2, %p304_p3  ;;  %p326_p5 = scmp.lt.s32.totalorder %s324_s24, %s317_s17 }
  0x27   : > { %p321_p12 = pneg %p320_p4  ;;  %p327_p8 = por %p326_p5, %p325_p11 }
  0x29   : > { %p328_p9 = pnand %p327_p8, %p321_p12 }
  0x2b   : > { %331 = shalt.err (!%p328_p9)
}
  0x2c   : > { %263 = dma.hbm_to_vmem [thread:$0]  (!%p487_p13), %s483_s29, 128, %s491_s3, %s90_s5  }
  0x2d   : > { %p591_p0 = scmp.lt.s32.totalorder %s398_s14, 3  ;;  %p592_p1 = scmp.ge.s32.totalorder %s398_s14, 1 }
  0x2f   : > { %p106_p3 = pnand %p592_p1, %p591_p0 }
  0x30   : > { %s525_s25 = sand.u32 (!%p106_p3), 1, %s390_s12  }
  0x31   : > { %109 = sbr.rel (%p106_p3) target bundleno = 101 (0x65), region = 24  ;;  %s249_s26 = sshll.u32 (!%p106_p3), %s525_s25, 3 }
  0x32   : > { %s112_s27 = scalar_lea.sflag (!%p106_p3), [#allocation5], %s525_s25  ;;  %s115_s28 = scalar_lea.vmem (!%p106_p3), [#allocation4], %s249_s26 }
  0x38   : > { %377 = dma.done.wait (%p463_p6), %s112_s27, 128  }
  0x39   : > { %379 = vsyncadd (%p463_p6), %s112_s27, 4294967168  ;;  %s251_s29 = sshll.u32 %s441_s0, 3  ;;  %v135_v0 = vlaneseq  ;;  %s143_s30 = sld [smem:[#allocation3]]  ;;  %v155_v15 = vld [vmem:[%s115_s28] sm:$0xff] }
  0x3a   : > { %v139_v1 = vstv %s251_s29  ;;  %s133_s21 = scalar_lea.vmem [#allocation7], %s249_s26  ;;  %v156_v17 = vmul.f32 2.0, %v155_v15  ;;  %s253_s4 = sshll.u32 %s441_s0, 7 }
  0x3b   : > { %v136_v2 = vshrl.u32 %v135_v0, 7  ;;  %v138_v3 = vand.u32 127, %v135_v0  ;;  %s173_s3 = sshll.u32 %s133_s21, 4  ;;  %s540_s7 = scalar_lea.hbm %s584_s2, %s253_s4  ;;  %s535_s3 = int_to_ptr.vmem [resolvable:$true] %s173_s3 }
  0x3c   : > { %s160_s8 = scalar_lea.sflag [#allocation6], %s525_s25  ;;  %s332_s9 = scalar_lea.vmem %s535_s3, 128 }
  0x3d   : > { %v140_v4 = vadd.s32 %v139_v1, %v136_v2  ;;  %p333_p6 = scmp.ne.s32.totalorder %s535_s3, %s332_s9  ;;  %p593_p11 = scmp.ne.s32.totalorder %s588_s22, 0 }
  0x3e   : > { %s401_s0 = smov [#allocation7]  }
  0x3f   : > { %v141_v5 = vmul.u32 128, %v140_v4  ;;  %v144_v6 = vstv %s143_s30  ;;  %p334_p12 = pnand %p333_p6, %p593_p11  ;;  %s336_s10 = sshll.u32 %s401_s0, 4  ;;  %s337_s10 = int_to_ptr.vmem [resolvable:$false] %s336_s10 }
  0x40   : > { %s338_s15 = scalar_lea.vmem %s337_s10, 256  ;;  %p339_p7 = scmp.lt.s32.totalorder %s535_s3, %s337_s10 }
  0x41   : > { %v142_v7 = vadd.s32 %v141_v5, %v138_v3  ;;  %p335_p13 = pneg %p334_p12  ;;  %p340_p10 = scmp.lt.s32.totalorder %s338_s15, %s332_s9 }
  0x43   : > { %v145_v8 = vxor.u32 %v144_v6, %v142_v7  ;;  %p341_p2 = por %p340_p10, %p339_p7 }
  0x45   : > { %v146_v9 = vshrl.u32 %v145_v8, 16  ;;  %p342_p4 = pnand %p341_p2, %p335_p13 }
  0x47   : > { %v147_v10 = vxor.u32 %v146_v9, %v145_v8 }
  0x49   : > { %v148_v11 = vmul.u32 2146121005, %v147_v10 }
  0x4b   : > { %v149_v12 = vshrl.u32 %v148_v11, 15 }
  0x4d   : > { %v150_v13 = vxor.u32 %v149_v12, %v148_v11 }
  0x4f   : > { %v151_v14 = vmul.u32 2221713035, %v150_v13 }
  0x51   : > { %v152_v16 = vshrl.u32 %v151_v14, 16 }
  0x53   : > { %v153_v18 = vxor.u32 %v152_v16, %v151_v14 }
  0x55   : > { %vm154_vm0 = vcmp.lt.u32.totalorder %v153_v18, 2147483648 }
  0x56   : > { %v157_v19 = vsel %vm154_vm0, %v156_v17, 0.0 }
  0x57   : > { %158 = vst [vmem:[%s133_s21] sm:$0xff] %v157_v19 }
  0x58   : > { %345 = shalt.err (!%p342_p4)
}
  0x59   : > { %s346_s17 = scalar_lea.hbm %s540_s7, 128  ;;  %s350_s24 = scalar_lea.hbm %s584_s2, 256 }
  0x5a   : > { %p347_p5 = scmp.ne.s32.totalorder %s540_s7, %s346_s17  ;;  %p351_p0 = scmp.lt.u32.totalorder %s540_s7, %s584_s2 }
  0x5b   : > { %p352_p1 = scmp.lt.u32.totalorder %s350_s24, %s346_s17  ;;  %p354_p6 = scmp.lt.u32.totalorder %s346_s17, %s540_s7 }
  0x5c   : > { %p348_p8 = pnand %p347_p5, %p593_p11 }
  0x5d   : > { %p353_p3 = por %p352_p1, %p351_p0 }
  0x5e   : > { %p349_p9 = pneg %p348_p8 }
  0x5f   : > { %p355_p12 = por %p354_p6, %p353_p3 }
  0x61   : > { %p356_p13 = pnand %p355_p12, %p349_p9 }
  0x63   : > { %359 = shalt.err (!%p356_p13)
}
  0x64   : > { %258 = dma.vmem_to_hbm [thread:$0]  (%p593_p11), %s535_s3, 128, %s540_s7, %s160_s8  }
  0x65 PF: > { %s185_s27 = sand.u32 1, %s386_s11   ;;  %p594_p7 = scmp.ne.s32.totalorder %s589_s23, 0 }
  0x66   : > { %p595_p10 = scmp.ge.s32.totalorder %s398_s14, 2  ;;  %s186_s28 = scalar_lea.sflag [#allocation6], %s185_s27 }
  0x68   : > { %p265_p2 = pnand %p595_p10, %p594_p7 }
  0x6a   : > { %381 = dma.done.wait (!%p265_p2), %s186_s28, 128  }
  0x6b   : > { %383 = vsyncadd (!%p265_p2), %s186_s28, 4294967168  ;;  %p16_p4 = scmp.ge.s32.totalorder %s445_s16, 4   ;;  %s596_s11 = smov %s390_s12 }
  0x6c   : > { %s597_s12 = smov %s394_s13  ;;  %s598_s13 = smov %s457_s19 }
  0x6d   : > { %s599_s14 = smov %s445_s16  ;;  %18 = sbr.rel (!%p16_p4) target bundleno = 7 (0x7), region = 69 }
  0x74   :  { %191 = vsyncpa [#allocation5], 1 }
  0x75   :  { %193 = vsyncpa [#allocation5 + $0x1], 1 }
  0x76   :  { %194 = vsyncpa [#allocation6], 1 }
  0x77   :  { %196 = vsyncpa [#allocation6 + $0x1], 1 }

</bundles_post_ra>
